<compile_context>
chip_gen: v6e
topology: v6e:2x2x1
jax: 0.10.0
libtpu: 0.0.40
codegen_flags: <defaults>
</compile_context>

<pallas_src>
import math

import jax
import jax.numpy as jnp
from jax import lax
from jax.experimental import pallas as pl
from jax.experimental.pallas import tpu as pltpu

_SQRT_HALF = 0.7071067811865476


def _round_up(x, m):
    return (x + m - 1) // m * m


# ---------------------------------------------------------------------------
# In-kernel math
# ---------------------------------------------------------------------------
def _erf_approx(x):
    # Abramowitz & Stegun 7.1.26 (max abs err ~1.5e-7); uses only abs/exp/mul/
    # add/where + an EUP reciprocal, all of which lower cleanly in Mosaic.
    a1, a2, a3, a4, a5 = (0.254829592, -0.284496736, 1.421413741,
                          -1.453152027, 1.061405429)
    p = 0.3275911
    ax = jnp.abs(x)
    d = 1.0 + p * ax
    # EUP approximate reciprocal + one Newton step: keeps the divide off the
    # VALU-heavy path while staying ~f32 accurate.
    t = pl.reciprocal(d, approx=True)
    t = t * (2.0 - d * t)
    poly = ((((a5 * t + a4) * t + a3) * t + a2) * t + a1) * t
    r = 1.0 - poly * jnp.exp(-ax * ax)
    return jnp.where(x < 0.0, -r, r)


def _gelu_exact(x):
    # PyTorch nn.GELU() default: 0.5 * x * (1 + erf(x / sqrt(2)))
    return 0.5 * x * (1.0 + _erf_approx(x * _SQRT_HALF))


def _mlp_kernel(x_ref, w1_ref, b1_ref, w2_ref, b2_ref, o_ref, acc_ref):
    # x: (tm, Kp); w1: (Kp, th); b1: (1, th); w2: (th, Ep); b2: (1, Ep)
    # o: (tm, Ep); acc: (tm, Ep) f32, revisited across the hidden-chunk axis.
    h_idx = pl.program_id(1)

    @pl.when(h_idx == 0)
    def _init():
        acc_ref[...] = jnp.zeros_like(acc_ref)

    h = jnp.dot(x_ref[...], w1_ref[...], preferred_element_type=jnp.float32)
    h = _gelu_exact(h + b1_ref[...].astype(jnp.float32))
    acc_ref[...] += jnp.dot(h.astype(w2_ref.dtype), w2_ref[...],
                            preferred_element_type=jnp.float32)

    @pl.when(h_idx == pl.num_programs(1) - 1)
    def _finalize():
        o_ref[...] = (acc_ref[...] + b2_ref[...].astype(jnp.float32)
                      ).astype(o_ref.dtype)


# ---------------------------------------------------------------------------
# Planning helpers
# ---------------------------------------------------------------------------
def _vmem_capacity_bytes():
    try:
        return int(pltpu.get_tpu_info().vmem_capacity_bytes)
    except Exception:
        return 64 * 1024 * 1024  # conservative fallback: v7x per-TensorCore VMEM


def _vmem_usage(tm, th, Kp, Ep, bx, bo):
    """Conservative per-grid-step VMEM estimate (weights counted double-buffered)."""
    return (2 * tm * Kp * bx          # streamed activation blocks (double-buffered)
            + 2 * Kp * th * bx        # fc1 weight blocks
            + 2 * 8 * th * bx         # fc1 bias blocks (sublane-padded)
            + 2 * th * Ep * bx        # fc2 weight blocks
            + 2 * 8 * Ep * bx         # fc2 bias blocks
            + 2 * tm * Ep * bo        # output blocks
            + tm * Ep * 4             # f32 accumulator scratch
            + tm * th * (4 + bx))     # f32 fc1 intermediate + its cast copy


def _plan_tiles(M, Kp, Hp, Ep, bx, bo, budget):
    """Pick (tm, th): prefer a single hidden pass (weights fetched once), then
    the largest MXU-friendly M tile, with a 128-row floor for large M."""
    Mb = _round_up(max(M, 1), 8)
    tm_cands = [Mb] if Mb <= 512 else [512, 256, 128]
    q = Hp // 128
    th_cands = [128 * d for d in range(q, 0, -1) if q % d == 0]  # divisors of Hp
    for th in th_cands:
        for tm in tm_cands:
            use = _vmem_usage(tm, th, Kp, Ep, bx, bo)
            if use <= budget:
                return tm, th, use
    tm = min(tm_cands[-1], Mb)                 # last resort
    return tm, 128, _vmem_usage(tm, 128, Kp, Ep, bx, bo)


# ---------------------------------------------------------------------------
# Host-side wrappers
# ---------------------------------------------------------------------------
def prepare_mlp_params(w1, b1, w2, b2, *, compute_dtype=jnp.bfloat16):
    """One-time weight prep (transpose to (in,out) layout, cast to the MXU
    operand dtype, zero-pad feature dims to multiples of 128). Run outside the
    hot path and reuse across calls."""
    cdt = jnp.dtype(compute_dtype)
    H, C_in = w1.shape
    C_out, H2 = w2.shape
    assert H2 == H and b1.shape == (H,) and b2.shape == (C_out,)
    Kp, Hp, Ep = _round_up(C_in, 128), _round_up(H, 128), _round_up(C_out, 128)

    w1m = w1.T.astype(cdt)
    if (Kp, Hp) != (C_in, H):
        w1m = jnp.pad(w1m, ((0, Kp - C_in), (0, Hp - H)))
    w2m = w2.T.astype(cdt)
    if (Hp, Ep) != (H, C_out):
        w2m = jnp.pad(w2m, ((0, Hp - H), (0, Ep - C_out)))
    b1m = b1.astype(cdt)
    if Hp != H:
        b1m = jnp.pad(b1m, (0, Hp - H))
    b2m = b2.astype(cdt)
    if Ep != C_out:
        b2m = jnp.pad(b2m, (0, Ep - C_out))
    return {"w1": w1m, "b1": b1m.reshape(1, Hp), "w2": w2m,
            "b2": b2m.reshape(1, Ep), "in_features": C_in, "out_features": C_out}


def mlp_forward(x, w1=None, b1=None, w2=None, b2=None, *, params=None,
                compute_dtype=None, drop_rate=0.0):
    """Fused MLP forward: fc2(gelu(fc1(x))). Dropout is identity (eval / p=0)."""
    if drop_rate != 0.0:
        # TODO(synk): stochastic training-mode dropout (p > 0) is not implemented.
        raise NotImplementedError("training-mode dropout (p > 0) is not supported")

    if params is None:
        if compute_dtype is None:
            # bf16 MXU operands (f32 accumulation) by default for f32 inputs.
            compute_dtype = jnp.bfloat16 if x.dtype == jnp.float32 else x.dtype
        params = prepare_mlp_params(w1, b1, w2, b2, compute_dtype=compute_dtype)

    w1m, b1m, w2m, b2m = params["w1"], params["b1"], params["w2"], params["b2"]
    C_in, C_out = params["in_features"], params["out_features"]
    Kp, Hp = w1m.shape
    Ep = w2m.shape[1]
    cdt = w1m.dtype

    orig_dtype = x.dtype
    lead = x.shape[:-1]
    assert x.shape[-1] == C_in
    M = math.prod(lead) if lead else 1

    bx = jnp.dtype(cdt).itemsize
    bo = jnp.dtype(orig_dtype).itemsize

    # Generation-aware VMEM budget (v5e/v6e ~128 MiB, v7x 64 MiB per TC; with
    # dimension_semantics=("parallel", ...) each TC holds its own weight copy).
    cap = _vmem_capacity_bytes()
    budget = int(cap * 0.75)
    tm, th, est = _plan_tiles(M, Kp, Hp, Ep, bx, bo, budget)
    grid_m = pl.cdiv(M, tm)
    grid_h = Hp // th
    vmem_limit = int(max(min(cap * 0.92, 1.5 * est), 32 * 1024 * 1024))

    # Only the activations are touched per call (no M padding; the grid uses
    # cdiv and Pallas masks the ragged last tile's output writes).
    x2 = x.reshape(M, C_in)
    if x2.dtype != cdt:
        x2 = x2.astype(cdt)
    if Kp != C_in:
        x2 = jnp.pad(x2, ((0, 0), (0, Kp - C_in)))

    weight_bytes = (Kp * Hp + Hp * Ep + Hp + Ep) * bx
    cost = pl.CostEstimate(
        flops=2 * M * (Kp * Hp + Hp * Ep),
        transcendentals=M * Hp,
        bytes_accessed=(M * Kp * bx + M * Ep * bo
                        + weight_bytes * (grid_m if grid_h > 1 else 1)),
    )

    def _build(single_buffer_weights):
        def wspec(shape, imap):
            if single_buffer_weights:
                return pl.BlockSpec(shape, imap, pipeline_mode=pl.Buffered(1))
            return pl.BlockSpec(shape, imap)

        return pl.pallas_call(
            _mlp_kernel,
            out_shape=jax.ShapeDtypeStruct((M, Ep), orig_dtype),
            grid_spec=pltpu.PrefetchScalarGridSpec(
                num_scalar_prefetch=0,
                grid=(grid_m, grid_h),
                in_specs=[
                    pl.BlockSpec((tm, Kp), lambda i, h: (i, 0)),   # activations
                    wspec((Kp, th), lambda i, h: (0, h)),          # fc1 weight
                    wspec((1, th), lambda i, h: (0, h)),           # fc1 bias
                    wspec((th, Ep), lambda i, h: (h, 0)),          # fc2 weight
                    wspec((1, Ep), lambda i, h: (0, 0)),           # fc2 bias
                ],
                out_specs=pl.BlockSpec((tm, Ep), lambda i, h: (i, 0)),
                scratch_shapes=[pltpu.VMEM((tm, Ep), jnp.float32)],
            ),
            compiler_params=pltpu.CompilerParams(
                dimension_semantics=("parallel", "arbitrary"),
                vmem_limit_bytes=vmem_limit,
            ),
            cost_estimate=cost,
        )

    # Weights are VMEM-resident when the hidden dim fits in a single chunk;
    # request single-buffering for them. The planner budgets 2x buffers, so the
    # fallback to the default double-buffered pipeline is always safe too.
    single_buf = grid_h == 1
    try:
        out = _build(single_buf)(x2, w1m, b1m, w2m, b2m)
    except Exception:
        if not single_buf:
            raise
        out = _build(False)(x2, w1m, b1m, w2m, b2m)

    if Ep != C_out:
        out = out[:, :C_out]
    return out.reshape(*lead, C_out)


def reference_mlp(x, w1, b1, w2, b2):
    # Pure-JAX reference matching PyTorch: fc1 -> exact GELU -> fc2 (dropout p=0).
    h = x @ w1.T + b1
    h = 0.5 * h * (1.0 + lax.erf(h * _SQRT_HALF))
    return h @ w2.T + b2


if __name__ == "__main__":
    key = jax.random.PRNGKey(0)
    B, N = 2, 8
    in_features, hidden_features, out_features = 32, 64, 32

    kx, kw1, kb1, kw2, kb2 = jax.random.split(key, 5)
    x = jax.random.normal(kx, (B, N, in_features), dtype=jnp.float32)

    def linear_init(kw, kb, fan_out, fan_in):
        bound = 1.0 / math.sqrt(fan_in)
        w = jax.random.uniform(kw, (fan_out, fan_in), minval=-bound,
                               maxval=bound, dtype=jnp.float32)
        b = jax.random.uniform(kb, (fan_out,), minval=-bound,
                               maxval=bound, dtype=jnp.float32)
        return w, b

    w1, b1 = linear_init(kw1, kb1, hidden_features, in_features)
    w2, b2 = linear_init(kw2, kb2, out_features, hidden_features)

    ref = reference_mlp(x, w1, b1, w2, b2)

    # Exact-precision path: f32 MXU operands, weights prepared once (hot-path
    # style), tight tolerance.
    params_f32 = prepare_mlp_params(w1, b1, w2, b2, compute_dtype=jnp.float32)
    out_f32 = jax.block_until_ready(mlp_forward(x, params=params_f32))
    assert out_f32.shape == (B, N, out_features), out_f32.shape
    err_f32 = float(jnp.max(jnp.abs(out_f32 - ref)))
    assert jnp.allclose(out_f32, ref, atol=2e-3, rtol=2e-3), err_f32

    # Default fast path: bf16 MXU operands with f32 accumulation.
    out_bf16 = jax.block_until_ready(mlp_forward(x, w1, b1, w2, b2))
    assert out_bf16.shape == (B, N, out_features), out_bf16.shape
    err_bf16 = float(jnp.max(jnp.abs(out_bf16 - ref)))
    assert jnp.allclose(out_bf16, ref, atol=3e-2, rtol=3e-2), err_bf16

    print("KERNEL_OK")
</pallas_src>

<mosaic_0001>
module attributes {stable_mosaic.version = 11 : i64} {
  func.func @_mlp_kernel(%arg0: i32, %arg1: i32, %arg2: memref<16x128xf32, #tpu.memory_space<vmem>>, %arg3: memref<128x128xf32, #tpu.memory_space<vmem>>, %arg4: memref<1x128xf32, #tpu.memory_space<vmem>>, %arg5: memref<128x128xf32, #tpu.memory_space<vmem>>, %arg6: memref<1x128xf32, #tpu.memory_space<vmem>>, %arg7: memref<16x128xf32, #tpu.memory_space<vmem>>, %arg8: memref<16x128xf32, #tpu.memory_space<vmem>>) attributes {dimension_semantics = [#tpu.dimension_semantics<parallel>, #tpu.dimension_semantics<arbitrary>], iteration_bounds = array<i64: 1, 1>, scalar_prefetch = 0 : i64, scratch_operands = 1 : i64, tpu.core_type = #tpu.core_type<tc>, window_params = [{transform_indices = @transform_0, window_bounds = array<i64: 16, 128>}, {pipeline_mode = #tpu.pipeline_mode<synchronous>, transform_indices = @transform_1, window_bounds = array<i64: 128, 128>}, {pipeline_mode = #tpu.pipeline_mode<synchronous>, transform_indices = @transform_2, window_bounds = array<i64: 1, 128>}, {pipeline_mode = #tpu.pipeline_mode<synchronous>, transform_indices = @transform_3, window_bounds = array<i64: 128, 128>}, {pipeline_mode = #tpu.pipeline_mode<synchronous>, transform_indices = @transform_4, window_bounds = array<i64: 1, 128>}, {transform_indices = @transform_5, window_bounds = array<i64: 16, 128>}]} {
    %c0_i32 = arith.constant 0 : i32
    %0 = arith.cmpi eq, %arg1, %c0_i32 : i32
    %1 = arith.extui %0 : i1 to i32
    %c0_i32_0 = arith.constant 0 : i32
    %2 = arith.cmpi ne, %1, %c0_i32_0 : i32
    scf.if %2 {
      %cst_30 = arith.constant 0.000000e+00 : f32
      %60 = vector.broadcast %cst_30 : f32 to vector<16x128xf32>
      %c0_31 = arith.constant 0 : index
      %c0_32 = arith.constant 0 : index
      %61 = vector.load %arg8[%c0_31, %c0_32] : memref<16x128xf32, #tpu.memory_space<vmem>>, vector<16x128xf32>
      tpu.vector_store %arg8[%c0_31, %c0_32], %60 {strides = array<i32>} : memref<16x128xf32, #tpu.memory_space<vmem>>, vector<16x128xf32>,
    } else {
    }
    %c0 = arith.constant 0 : index
    %c0_1 = arith.constant 0 : index
    %3 = vector.load %arg2[%c0, %c0_1] : memref<16x128xf32, #tpu.memory_space<vmem>>, vector<16x128xf32>
    %c0_2 = arith.constant 0 : index
    %c0_3 = arith.constant 0 : index
    %4 = vector.load %arg3[%c0_2, %c0_3] : memref<128x128xf32, #tpu.memory_space<vmem>>, vector<128x128xf32>
    %cst = arith.constant dense<0.000000e+00> : vector<16x128xf32>
    %5 = tpu.matmul %3, %4, %cst {dimension_numbers = #tpu.dot_dimension_numbers<[1], [0], [0], [1], [0, 0, 1, 1], [], []>} : vector<16x128xf32>, vector<128x128xf32>, vector<16x128xf32> -> vector<16x128xf32>
    %c0_4 = arith.constant 0 : index
    %c0_5 = arith.constant 0 : index
    %6 = vector.load %arg4[%c0_4, %c0_5] : memref<1x128xf32, #tpu.memory_space<vmem>>, vector<1x128xf32>
    %7 = vector.broadcast %6 : vector<1x128xf32> to vector<16x128xf32>
    %8 = arith.addf %5, %7 : vector<16x128xf32>
    %cst_6 = arith.constant 5.000000e-01 : f32
    %9 = vector.broadcast %cst_6 : f32 to vector<16x128xf32>
    %10 = arith.mulf %9, %8 : vector<16x128xf32>
    %cst_7 = arith.constant 0.707106769 : f32
    %11 = vector.broadcast %cst_7 : f32 to vector<16x128xf32>
    %12 = arith.mulf %8, %11 : vector<16x128xf32>
    %13 = math.absf %12 : vector<16x128xf32>
    %cst_8 = arith.constant 0.327591091 : f32
    %14 = vector.broadcast %cst_8 : f32 to vector<16x128xf32>
    %15 = arith.mulf %14, %13 : vector<16x128xf32>
    %cst_9 = arith.constant 1.000000e+00 : f32
    %16 = vector.broadcast %cst_9 : f32 to vector<16x128xf32>
    %17 = arith.addf %16, %15 : vector<16x128xf32>
    %18 = tpu.reciprocal %17 {approx = true} : vector<16x128xf32> -> vector<16x128xf32>
    %19 = arith.mulf %17, %18 : vector<16x128xf32>
    %cst_10 = arith.constant 2.000000e+00 : f32
    %20 = vector.broadcast %cst_10 : f32 to vector<16x128xf32>
    %21 = arith.subf %20, %19 : vector<16x128xf32>
    %22 = arith.mulf %18, %21 : vector<16x128xf32>
    %cst_11 = arith.constant 1.06140542 : f32
    %23 = vector.broadcast %cst_11 : f32 to vector<16x128xf32>
    %24 = arith.mulf %23, %22 : vector<16x128xf32>
    %cst_12 = arith.constant -1.45315206 : f32
    %25 = vector.broadcast %cst_12 : f32 to vector<16x128xf32>
    %26 = arith.addf %24, %25 : vector<16x128xf32>
    %27 = arith.mulf %26, %22 : vector<16x128xf32>
    %cst_13 = arith.constant 1.42141378 : f32
    %28 = vector.broadcast %cst_13 : f32 to vector<16x128xf32>
    %29 = arith.addf %27, %28 : vector<16x128xf32>
    %30 = arith.mulf %29, %22 : vector<16x128xf32>
    %cst_14 = arith.constant -0.284496725 : f32
    %31 = vector.broadcast %cst_14 : f32 to vector<16x128xf32>
    %32 = arith.addf %30, %31 : vector<16x128xf32>
    %33 = arith.mulf %32, %22 : vector<16x128xf32>
    %cst_15 = arith.constant 0.254829586 : f32
    %34 = vector.broadcast %cst_15 : f32 to vector<16x128xf32>
    %35 = arith.addf %33, %34 : vector<16x128xf32>
    %36 = arith.mulf %35, %22 : vector<16x128xf32>
    %cst_16 = arith.constant 0.000000e+00 : f32
    %37 = vector.broadcast %cst_16 : f32 to vector<16x128xf32>
    %38 = arith.subf %37, %13 : vector<16x128xf32>
    %39 = arith.mulf %38, %13 : vector<16x128xf32>
    %40 = math.exp %39 : vector<16x128xf32>
    %41 = arith.mulf %36, %40 : vector<16x128xf32>
    %cst_17 = arith.constant 1.000000e+00 : f32
    %42 = vector.broadcast %cst_17 : f32 to vector<16x128xf32>
    %43 = arith.subf %42, %41 : vector<16x128xf32>
    %cst_18 = arith.constant 0.000000e+00 : f32
    %44 = vector.broadcast %cst_18 : f32 to vector<16x128xf32>
    %45 = arith.cmpf olt, %12, %44 : vector<16x128xf32>
    %cst_19 = arith.constant 0.000000e+00 : f32
    %46 = vector.broadcast %cst_19 : f32 to vector<16x128xf32>
    %47 = arith.subf %46, %43 : vector<16x128xf32>
    %48 = arith.select %45, %47, %43 : vector<16x128xi1>, vector<16x128xf32>
    %cst_20 = arith.constant 1.000000e+00 : f32
    %49 = vector.broadcast %cst_20 : f32 to vector<16x128xf32>
    %50 = arith.addf %49, %48 : vector<16x128xf32>
    %51 = arith.mulf %10, %50 : vector<16x128xf32>
    %c0_21 = arith.constant 0 : index
    %c0_22 = arith.constant 0 : index
    %52 = vector.load %arg8[%c0_21, %c0_22] : memref<16x128xf32, #tpu.memory_space<vmem>>, vector<16x128xf32>
    %c0_23 = arith.constant 0 : index
    %c0_24 = arith.constant 0 : index
    %53 = vector.load %arg5[%c0_23, %c0_24] : memref<128x128xf32, #tpu.memory_space<vmem>>, vector<128x128xf32>
    %cst_25 = arith.constant dense<0.000000e+00> : vector<16x128xf32>
    %54 = tpu.matmul %51, %53, %cst_25 {dimension_numbers = #tpu.dot_dimension_numbers<[1], [0], [0], [1], [0, 0, 1, 1], [], []>} : vector<16x128xf32>, vector<128x128xf32>, vector<16x128xf32> -> vector<16x128xf32>
    %55 = arith.addf %52, %54 : vector<16x128xf32>
    %c0_26 = arith.constant 0 : index
    %c0_27 = arith.constant 0 : index
    %56 = vector.load %arg8[%c0_26, %c0_27] : memref<16x128xf32, #tpu.memory_space<vmem>>, vector<16x128xf32>
    tpu.vector_store %arg8[%c0_26, %c0_27], %55 {strides = array<i32>} : memref<16x128xf32, #tpu.memory_space<vmem>>, vector<16x128xf32>,
    %c0_i32_28 = arith.constant 0 : i32
    %57 = arith.cmpi eq, %arg1, %c0_i32_28 : i32
    %58 = arith.extui %57 : i1 to i32
    %c0_i32_29 = arith.constant 0 : i32
    %59 = arith.cmpi ne, %58, %c0_i32_29 : i32
    scf.if %59 {
      %c0_30 = arith.constant 0 : index
      %c0_31 = arith.constant 0 : index
      %60 = vector.load %arg8[%c0_30, %c0_31] : memref<16x128xf32, #tpu.memory_space<vmem>>, vector<16x128xf32>
      %c0_32 = arith.constant 0 : index
      %c0_33 = arith.constant 0 : index
      %61 = vector.load %arg6[%c0_32, %c0_33] : memref<1x128xf32, #tpu.memory_space<vmem>>, vector<1x128xf32>
      %62 = vector.broadcast %61 : vector<1x128xf32> to vector<16x128xf32>
      %63 = arith.addf %60, %62 : vector<16x128xf32>
      %c0_34 = arith.constant 0 : index
      %c0_35 = arith.constant 0 : index
      %64 = vector.load %arg7[%c0_34, %c0_35] : memref<16x128xf32, #tpu.memory_space<vmem>>, vector<16x128xf32>
      tpu.vector_store %arg7[%c0_34, %c0_35], %63 {strides = array<i32>} : memref<16x128xf32, #tpu.memory_space<vmem>>, vector<16x128xf32>,
    } else {
    }
    return
  }
  func.func @transform_0(%arg0: i32, %arg1: i32) -> (i32, i32) {
    %c0_i32 = arith.constant 0 : i32
    %c0_i32_0 = arith.constant 0 : i32
    return %arg0, %c0_i32 : i32, i32
  }
  func.func @transform_1(%arg0: i32, %arg1: i32) -> (i32, i32) {
    %c0_i32 = arith.constant 0 : i32
    %c0_i32_0 = arith.constant 0 : i32
    return %c0_i32, %arg1 : i32, i32
  }
  func.func @transform_2(%arg0: i32, %arg1: i32) -> (i32, i32) {
    %c0_i32 = arith.constant 0 : i32
    %c0_i32_0 = arith.constant 0 : i32
    return %c0_i32, %arg1 : i32, i32
  }
  func.func @transform_3(%arg0: i32, %arg1: i32) -> (i32, i32) {
    %c0_i32 = arith.constant 0 : i32
    %c0_i32_0 = arith.constant 0 : i32
    return %arg1, %c0_i32 : i32, i32
  }
  func.func @transform_4(%arg0: i32, %arg1: i32) -> (i32, i32) {
    %c0_i32 = arith.constant 0 : i32
    %c0_i32_0 = arith.constant 0 : i32
    %c0_i32_1 = arith.constant 0 : i32
    return %c0_i32, %c0_i32_0 : i32, i32
  }
  func.func @transform_5(%arg0: i32, %arg1: i32) -> (i32, i32) {
    %c0_i32 = arith.constant 0 : i32
    %c0_i32_0 = arith.constant 0 : i32
    return %arg0, %c0_i32 : i32, i32
  }
}

module attributes {stable_mosaic.version = 11 : i64} {
  func.func @_mlp_kernel(%arg0: i32, %arg1: i32, %arg2: memref<16x128xf32, #tpu.memory_space<vmem>>, %arg3: memref<128x128xf32, #tpu.memory_space<vmem>>, %arg4: memref<1x128xf32, #tpu.memory_space<vmem>>, %arg5: memref<128x128xf32, #tpu.memory_space<vmem>>, %arg6: memref<1x128xf32, #tpu.memory_space<vmem>>, %arg7: memref<16x128xf32, #tpu.memory_space<vmem>>, %arg8: memref<16x128xf32, #tpu.memory_space<vmem>>) attributes {dimension_semantics = [#tpu.dimension_semantics<parallel>, #tpu.dimension_semantics<arbitrary>], iteration_bounds = array<i64: 1, 1>, scalar_prefetch = 0 : i64, scratch_operands = 1 : i64, tpu.core_type = #tpu.core_type<tc>, window_params = [{transform_indices = @transform_0, window_bounds = array<i64: 16, 128>}, {transform_indices = @transform_1, window_bounds = array<i64: 128, 128>}, {transform_indices = @transform_2, window_bounds = array<i64: 1, 128>}, {transform_indices = @transform_3, window_bounds = array<i64: 128, 128>}, {pipeline_mode = #tpu.pipeline_mode<synchronous>, transform_indices = @transform_4, window_bounds = array<i64: 1, 128>}, {transform_indices = @transform_5, window_bounds = array<i64: 16, 128>}]} {
    %c0_i32 = arith.constant 0 : i32
    %0 = arith.cmpi eq, %arg1, %c0_i32 : i32
    %1 = arith.extui %0 : i1 to i32
    %c0_i32_0 = arith.constant 0 : i32
    %2 = arith.cmpi ne, %1, %c0_i32_0 : i32
    scf.if %2 {
      %cst_30 = arith.constant 0.000000e+00 : f32
      %60 = vector.broadcast %cst_30 : f32 to vector<16x128xf32>
      %c0_31 = arith.constant 0 : index
      %c0_32 = arith.constant 0 : index
      %61 = vector.load %arg8[%c0_31, %c0_32] : memref<16x128xf32, #tpu.memory_space<vmem>>, vector<16x128xf32>
      tpu.vector_store %arg8[%c0_31, %c0_32], %60 {strides = array<i32>} : memref<16x128xf32, #tpu.memory_space<vmem>>, vector<16x128xf32>,
    } else {
    }
    %c0 = arith.constant 0 : index
    %c0_1 = arith.constant 0 : index
    %3 = vector.load %arg2[%c0, %c0_1] : memref<16x128xf32, #tpu.memory_space<vmem>>, vector<16x128xf32>
    %c0_2 = arith.constant 0 : index
    %c0_3 = arith.constant 0 : index
    %4 = vector.load %arg3[%c0_2, %c0_3] : memref<128x128xf32, #tpu.memory_space<vmem>>, vector<128x128xf32>
    %cst = arith.constant dense<0.000000e+00> : vector<16x128xf32>
    %5 = tpu.matmul %3, %4, %cst {dimension_numbers = #tpu.dot_dimension_numbers<[1], [0], [0], [1], [0, 0, 1, 1], [], []>} : vector<16x128xf32>, vector<128x128xf32>, vector<16x128xf32> -> vector<16x128xf32>
    %c0_4 = arith.constant 0 : index
    %c0_5 = arith.constant 0 : index
    %6 = vector.load %arg4[%c0_4, %c0_5] : memref<1x128xf32, #tpu.memory_space<vmem>>, vector<1x128xf32>
    %7 = vector.broadcast %6 : vector<1x128xf32> to vector<16x128xf32>
    %8 = arith.addf %5, %7 : vector<16x128xf32>
    %cst_6 = arith.constant 5.000000e-01 : f32
    %9 = vector.broadcast %cst_6 : f32 to vector<16x128xf32>
    %10 = arith.mulf %9, %8 : vector<16x128xf32>
    %cst_7 = arith.constant 0.707106769 : f32
    %11 = vector.broadcast %cst_7 : f32 to vector<16x128xf32>
    %12 = arith.mulf %8, %11 : vector<16x128xf32>
    %13 = math.absf %12 : vector<16x128xf32>
    %cst_8 = arith.constant 0.327591091 : f32
    %14 = vector.broadcast %cst_8 : f32 to vector<16x128xf32>
    %15 = arith.mulf %14, %13 : vector<16x128xf32>
    %cst_9 = arith.constant 1.000000e+00 : f32
    %16 = vector.broadcast %cst_9 : f32 to vector<16x128xf32>
    %17 = arith.addf %16, %15 : vector<16x128xf32>
    %18 = tpu.reciprocal %17 {approx = true} : vector<16x128xf32> -> vector<16x128xf32>
    %19 = arith.mulf %17, %18 : vector<16x128xf32>
    %cst_10 = arith.constant 2.000000e+00 : f32
    %20 = vector.broadcast %cst_10 : f32 to vector<16x128xf32>
    %21 = arith.subf %20, %19 : vector<16x128xf32>
    %22 = arith.mulf %18, %21 : vector<16x128xf32>
    %cst_11 = arith.constant 1.06140542 : f32
    %23 = vector.broadcast %cst_11 : f32 to vector<16x128xf32>
    %24 = arith.mulf %23, %22 : vector<16x128xf32>
    %cst_12 = arith.constant -1.45315206 : f32
    %25 = vector.broadcast %cst_12 : f32 to vector<16x128xf32>
    %26 = arith.addf %24, %25 : vector<16x128xf32>
    %27 = arith.mulf %26, %22 : vector<16x128xf32>
    %cst_13 = arith.constant 1.42141378 : f32
    %28 = vector.broadcast %cst_13 : f32 to vector<16x128xf32>
    %29 = arith.addf %27, %28 : vector<16x128xf32>
    %30 = arith.mulf %29, %22 : vector<16x128xf32>
    %cst_14 = arith.constant -0.284496725 : f32
    %31 = vector.broadcast %cst_14 : f32 to vector<16x128xf32>
    %32 = arith.addf %30, %31 : vector<16x128xf32>
    %33 = arith.mulf %32, %22 : vector<16x128xf32>
    %cst_15 = arith.constant 0.254829586 : f32
    %34 = vector.broadcast %cst_15 : f32 to vector<16x128xf32>
    %35 = arith.addf %33, %34 : vector<16x128xf32>
    %36 = arith.mulf %35, %22 : vector<16x128xf32>
    %cst_16 = arith.constant 0.000000e+00 : f32
    %37 = vector.broadcast %cst_16 : f32 to vector<16x128xf32>
    %38 = arith.subf %37, %13 : vector<16x128xf32>
    %39 = arith.mulf %38, %13 : vector<16x128xf32>
    %40 = math.exp %39 : vector<16x128xf32>
    %41 = arith.mulf %36, %40 : vector<16x128xf32>
    %cst_17 = arith.constant 1.000000e+00 : f32
    %42 = vector.broadcast %cst_17 : f32 to vector<16x128xf32>
    %43 = arith.subf %42, %41 : vector<16x128xf32>
    %cst_18 = arith.constant 0.000000e+00 : f32
    %44 = vector.broadcast %cst_18 : f32 to vector<16x128xf32>
    %45 = arith.cmpf olt, %12, %44 : vector<16x128xf32>
    %cst_19 = arith.constant 0.000000e+00 : f32
    %46 = vector.broadcast %cst_19 : f32 to vector<16x128xf32>
    %47 = arith.subf %46, %43 : vector<16x128xf32>
    %48 = arith.select %45, %47, %43 : vector<16x128xi1>, vector<16x128xf32>
    %cst_20 = arith.constant 1.000000e+00 : f32
    %49 = vector.broadcast %cst_20 : f32 to vector<16x128xf32>
    %50 = arith.addf %49, %48 : vector<16x128xf32>
    %51 = arith.mulf %10, %50 : vector<16x128xf32>
    %c0_21 = arith.constant 0 : index
    %c0_22 = arith.constant 0 : index
    %52 = vector.load %arg8[%c0_21, %c0_22] : memref<16x128xf32, #tpu.memory_space<vmem>>, vector<16x128xf32>
    %c0_23 = arith.constant 0 : index
    %c0_24 = arith.constant 0 : index
    %53 = vector.load %arg5[%c0_23, %c0_24] : memref<128x128xf32, #tpu.memory_space<vmem>>, vector<128x128xf32>
    %cst_25 = arith.constant dense<0.000000e+00> : vector<16x128xf32>
    %54 = tpu.matmul %51, %53, %cst_25 {dimension_numbers = #tpu.dot_dimension_numbers<[1], [0], [0], [1], [0, 0, 1, 1], [], []>} : vector<16x128xf32>, vector<128x128xf32>, vector<16x128xf32> -> vector<16x128xf32>
    %55 = arith.addf %52, %54 : vector<16x128xf32>
    %c0_26 = arith.constant 0 : index
    %c0_27 = arith.constant 0 : index
    %56 = vector.load %arg8[%c0_26, %c0_27] : memref<16x128xf32, #tpu.memory_space<vmem>>, vector<16x128xf32>
    tpu.vector_store %arg8[%c0_26, %c0_27], %55 {strides = array<i32>} : memref<16x128xf32, #tpu.memory_space<vmem>>, vector<16x128xf32>,
    %c0_i32_28 = arith.constant 0 : i32
    %57 = arith.cmpi eq, %arg1, %c0_i32_28 : i32
    %58 = arith.extui %57 : i1 to i32
    %c0_i32_29 = arith.constant 0 : i32
    %59 = arith.cmpi ne, %58, %c0_i32_29 : i32
    scf.if %59 {
      %c0_30 = arith.constant 0 : index
      %c0_31 = arith.constant 0 : index
      %60 = vector.load %arg8[%c0_30, %c0_31] : memref<16x128xf32, #tpu.memory_space<vmem>>, vector<16x128xf32>
      %c0_32 = arith.constant 0 : index
      %c0_33 = arith.constant 0 : index
      %61 = vector.load %arg6[%c0_32, %c0_33] : memref<1x128xf32, #tpu.memory_space<vmem>>, vector<1x128xf32>
      %62 = vector.broadcast %61 : vector<1x128xf32> to vector<16x128xf32>
      %63 = arith.addf %60, %62 : vector<16x128xf32>
      %c0_34 = arith.constant 0 : index
      %c0_35 = arith.constant 0 : index
      %64 = vector.load %arg7[%c0_34, %c0_35] : memref<16x128xf32, #tpu.memory_space<vmem>>, vector<16x128xf32>
      tpu.vector_store %arg7[%c0_34, %c0_35], %63 {strides = array<i32>} : memref<16x128xf32, #tpu.memory_space<vmem>>, vector<16x128xf32>,
    } else {
    }
    return
  }
  func.func @transform_0(%arg0: i32, %arg1: i32) -> (i32, i32) {
    %c0_i32 = arith.constant 0 : i32
    %c0_i32_0 = arith.constant 0 : i32
    return %arg0, %c0_i32 : i32, i32
  }
  func.func @transform_1(%arg0: i32, %arg1: i32) -> (i32, i32) {
    %c0_i32 = arith.constant 0 : i32
    %c0_i32_0 = arith.constant 0 : i32
    return %c0_i32, %arg1 : i32, i32
  }
  func.func @transform_2(%arg0: i32, %arg1: i32) -> (i32, i32) {
    %c0_i32 = arith.constant 0 : i32
    %c0_i32_0 = arith.constant 0 : i32
    return %c0_i32, %arg1 : i32, i32
  }
  func.func @transform_3(%arg0: i32, %arg1: i32) -> (i32, i32) {
    %c0_i32 = arith.constant 0 : i32
    %c0_i32_0 = arith.constant 0 : i32
    return %arg1, %c0_i32 : i32, i32
  }
  func.func @transform_4(%arg0: i32, %arg1: i32) -> (i32, i32) {
    %c0_i32 = arith.constant 0 : i32
    %c0_i32_0 = arith.constant 0 : i32
    %c0_i32_1 = arith.constant 0 : i32
    return %c0_i32, %c0_i32_0 : i32, i32
  }
  func.func @transform_5(%arg0: i32, %arg1: i32) -> (i32, i32) {
    %c0_i32 = arith.constant 0 : i32
    %c0_i32_0 = arith.constant 0 : i32
    return %arg0, %c0_i32 : i32, i32
  }
}

</mosaic_0001>

<bundles_post_ra>
// kernel: tpu_custom_call.1
= control target key start
LH: loop header
LB: loop body
LE: loop exit
PB: predicated region body
PF: predicated region fallthrough
CT: control target
= control target key end

     0   :  { %10 = vsyncpa [#allocation4], 0  ;;  %s631_s0 = inlined_call_operand.hbm [shape: f32[16,128], index: 0, kind: input, shape index: {}]   ;;  %s632_s1 = inlined_call_operand.hbm [shape: f32[128,128], index: 1, kind: input, shape index: {}]   ;;  %s633_s2 = inlined_call_operand.vmem [shape: f32[1,128], index: 2, kind: input, shape index: {}]   ;;  %s634_s3 = inlined_call_operand.hbm [shape: f32[128,128], index: 3, kind: input, shape index: {}]   ;;  %s635_s4 = inlined_call_operand.vmem [shape: f32[1,128], index: 4, kind: input, shape index: {}]   ;;  %s636_s5 = inlined_call_operand.hbm [shape: f32[16,128], index: 5, kind: output, shape index: {}]  }
   0x1   :  { %11 = vsyncpa [#allocation7], 0 }
   0x2   :  { %12 = vsyncpa [#allocation5], 0  ;;  %s565_s18 = smov [#allocation6]   ;;  %s566_s20 = smov [#allocation3]  }
   0x3   :  { %s30_s19 = sshll.u32 %s565_s18, 4  ;;  %s18_s21 = sshll.u32 %s566_s20, 4  ;;  %s31_s19 = int_to_ptr.vmem [resolvable:$true] %s30_s19  ;;  %s19_s21 = int_to_ptr.vmem [resolvable:$true] %s18_s21 }
   0x4   :  { %s487_s22 = scalar_lea.vmem %s31_s19, 2048  ;;  %p492_p1 = scmp.lt.s32.totalorder %s31_s19, %s31_s19 }
   0x5   :  { %p488_p0 = scmp.ne.s32.totalorder %s31_s19, %s487_s22  ;;  %p493_p2 = scmp.lt.s32.totalorder %s487_s22, %s487_s22 }
   0x7   :  { %p494_p3 = por %p493_p2, %p492_p1 }
   0x9   :  { %p495_p4 = pnand %p494_p3, %p488_p0 }
   0xb   :  { %498 = shalt.err (!%p495_p4)
}
   0xc   :  { %s567_s23 = smov 128   ;;  %s568_s24 = smov 8  }
   0xd   :  { %36 = dma.hbm_to_vmem [thread:$0]  %s632_s1, 2048, %s31_s19, [#allocation7], %s567_s23, %s567_s23, %s568_s24  }
   0xe   :  { %s507_s27 = scalar_lea.vmem %s19_s21, 256  ;;  %p512_p6 = scmp.lt.s32.totalorder %s19_s21, %s19_s21 }
   0xf   :  { %p508_p5 = scmp.ne.s32.totalorder %s19_s21, %s507_s27  ;;  %p513_p7 = scmp.lt.s32.totalorder %s507_s27, %s507_s27 }
  0x11   :  { %p514_p8 = por %p513_p7, %p512_p6 }
  0x13   :  { %p515_p9 = pnand %p514_p8, %p508_p5 }
  0x15   :  { %518 = shalt.err (!%p515_p9)
}
  0x16   :  { %24 = dma.hbm_to_vmem [thread:$0]  %s631_s0, 256, %s19_s21, [#allocation4], %s567_s23, %s567_s23, %s568_s24  }
  0x17   :  { %s569_s30 = smov [#allocation8]  }
  0x18   :  { %s44_s6 = sshll.u32 %s569_s30, 4  ;;  %s45_s6 = int_to_ptr.vmem [resolvable:$true] %s44_s6 }
  0x19   :  { %s527_s7 = scalar_lea.vmem %s45_s6, 2048  ;;  %p532_p11 = scmp.lt.s32.totalorder %s45_s6, %s45_s6 }
  0x1a   :  { %p528_p10 = scmp.ne.s32.totalorder %s45_s6, %s527_s7  ;;  %p533_p12 = scmp.lt.s32.totalorder %s527_s7, %s527_s7 }
  0x1c   :  { %p534_p13 = por %p533_p12, %p532_p11 }
  0x1e   :  { %p535_p0 = pnand %p534_p13, %p528_p10 }
  0x20   :  { %538 = shalt.err (!%p535_p0)
}
  0x21   :  { %50 = dma.hbm_to_vmem [thread:$0]  %s634_s3, 2048, %s45_s6, [#allocation7], %s567_s23, %s567_s23, %s568_s24  }
  0x22   :  { %559 = dma.done.wait [#allocation4], 256  }
  0x23   :  { %560 = vsyncadd [#allocation4], 4294967040 }
  0x24   :  { %561 = dma.done.wait [#allocation7], 4096  }
  0x25   :  { %562 = vsyncadd [#allocation7], 4294963200  ;;  %v85_v0 = vld [vmem:[#allocation6 + $0x78] sm:$0xff]  ;;  %v84_v1 = vld [vmem:[#allocation6 + $0x70] sm:$0xff]  ;;  %s570_s10 = smov [#allocation9]  }
  0x26   :  { %395 = vmatprep.subr.mxu0 %v85_v0  ;;  %v83_v2 = vld [vmem:[#allocation6 + $0x68] sm:$0xff]  ;;  %v82_v3 = vld [vmem:[#allocation6 + $0x60] sm:$0xff]  ;;  %v68_v4 = vld [vmem:[#allocation3] sm:$0xff]  ;;  %s344_s11 = sshll.u32 %s570_s10, 4  ;;  %s345_s11 = int_to_ptr.vmem [resolvable:$true] %s344_s11 }
  0x27   :  { %396 = vmatpush3.msra.mxu0 %v85_v0  ;;  %v81_v5 = vld [vmem:[#allocation6 + $0x58] sm:$0xff]  ;;  %427 = vmatprep.mubr.f32.mxu0 %v68_v4  ;;  %v80_v6 = vld [vmem:[#allocation6 + $0x50] sm:$0xff]  ;;  %v79_v7 = vld [vmem:[#allocation6 + $0x48] sm:$0xff]  ;;  %s539_s12 = scalar_lea.vmem %s345_s11, 256  ;;  %p544_p2 = scmp.lt.s32.totalorder %s345_s11, %s345_s11 }
  0x28   :  { %397 = vmatprep.subr.mxu0 %v84_v1  ;;  %v78_v8 = vld [vmem:[#allocation6 + $0x40] sm:$0xff]  ;;  %v77_v9 = vld [vmem:[#allocation6 + $0x38] sm:$0xff]  ;;  %v76_v10 = vld [vmem:[#allocation6 + $0x30] sm:$0xff]  ;;  %p540_p1 = scmp.ne.s32.totalorder %s345_s11, %s539_s12  ;;  %p545_p3 = scmp.lt.s32.totalorder %s539_s12, %s539_s12 }
  0x29   :  { %398 = vmatpush3.msra.mxu0 %v84_v1  ;;  %v75_v11 = vld [vmem:[#allocation6 + $0x28] sm:$0xff]  ;;  %v74_v12 = vld [vmem:[#allocation6 + $0x20] sm:$0xff]  ;;  %v73_v13 = vld [vmem:[#allocation6 + $0x18] sm:$0xff] }
  0x2a   :  { %399 = vmatprep.subr.mxu0 %v83_v2  ;;  %v72_v14 = vld [vmem:[#allocation6 + $0x10] sm:$0xff]  ;;  %v71_v15 = vld [vmem:[#allocation6 + $0x8] sm:$0xff]  ;;  %v70_v16 = vld [vmem:[#allocation6] sm:$0xff]  ;;  %p546_p4 = por %p545_p3, %p544_p2 }
  0x2b   :  { %400 = vmatpush3.msra.mxu0 %v83_v2  ;;  %v69_v17 = vld [vmem:[#allocation3 + $0x8] sm:$0xff]  ;;  %v242_v19 = vld [vmem:[#allocation8 + $0x70] sm:$0xff]  ;;  %v241_v20 = vld [vmem:[#allocation8 + $0x68] sm:$0xff] }
  0x2c   :  { %401 = vmatprep.subr.mxu0 %v82_v3  ;;  %v243_v18 = vld [vmem:[#allocation8 + $0x78] sm:$0xff]  ;;  %v240_v21 = vld [vmem:[#allocation8 + $0x60] sm:$0xff]  ;;  %v238_v23 = vld [vmem:[#allocation8 + $0x50] sm:$0xff]  ;;  %p547_p5 = pnand %p546_p4, %p540_p1 }
  0x2d   :  { %402 = vmatpush3.msra.mxu0 %v82_v3  ;;  %430 = vmatprep.subr.mxu1 %v243_v18  ;;  %v239_v22 = vld [vmem:[#allocation8 + $0x58] sm:$0xff]  ;;  %v237_v24 = vld [vmem:[#allocation8 + $0x48] sm:$0xff]  ;;  %v236_v25 = vld [vmem:[#allocation8 + $0x40] sm:$0xff] }
  0x2e   :  { %403 = vmatprep.subr.mxu0 %v81_v5  ;;  %431 = vmatpush3.msra.mxu1 %v243_v18  ;;  %v235_v26 = vld [vmem:[#allocation8 + $0x38] sm:$0xff]  ;;  %v234_v27 = vld [vmem:[#allocation8 + $0x30] sm:$0xff]  ;;  %v233_v28 = vld [vmem:[#allocation8 + $0x28] sm:$0xff] }
  0x2f   :  { %404 = vmatpush3.msra.mxu0 %v81_v5  ;;  %432 = vmatprep.subr.mxu1 %v242_v19  ;;  %v232_v29 = vld [vmem:[#allocation8 + $0x20] sm:$0xff]  ;;  %v231_v30 = vld [vmem:[#allocation8 + $0x18] sm:$0xff]  ;;  %v230_v31 = vld [vmem:[#allocation8 + $0x10] sm:$0xff] }
  0x30   :  { %405 = vmatprep.subr.mxu0 %v80_v6  ;;  %433 = vmatpush3.msra.mxu1 %v242_v19  ;;  %v229_v32 = vld [vmem:[#allocation8 + $0x8] sm:$0xff]  ;;  %v228_v33 = vld [vmem:[#allocation8] sm:$0xff]  ;;  %v357_v34 = vld [vmem:[%s633_s2] ss:$0 sm:$0xff] }
  0x31   :  { %406 = vmatpush3.msra.mxu0 %v80_v6  ;;  %434 = vmatprep.subr.mxu1 %v241_v20 }
  0x32   :  { %407 = vmatprep.subr.mxu0 %v79_v7  ;;  %435 = vmatpush3.msra.mxu1 %v241_v20 }
  0x33   :  { %408 = vmatpush3.msra.mxu0 %v79_v7  ;;  %436 = vmatprep.subr.mxu1 %v240_v21 }
  0x34   :  { %409 = vmatprep.subr.mxu0 %v78_v8  ;;  %437 = vmatpush3.msra.mxu1 %v240_v21 }
  0x35   :  { %410 = vmatpush3.msra.mxu0 %v78_v8  ;;  %438 = vmatprep.subr.mxu1 %v239_v22 }
  0x36   :  { %411 = vmatprep.subr.mxu0 %v77_v9  ;;  %439 = vmatpush3.msra.mxu1 %v239_v22 }
  0x37   :  { %412 = vmatpush3.msra.mxu0 %v77_v9  ;;  %440 = vmatprep.subr.mxu1 %v238_v23 }
  0x38   :  { %413 = vmatprep.subr.mxu0 %v76_v10  ;;  %441 = vmatpush3.msra.mxu1 %v238_v23 }
  0x39   :  { %414 = vmatpush3.msra.mxu0 %v76_v10  ;;  %442 = vmatprep.subr.mxu1 %v237_v24 }
  0x3a   :  { %415 = vmatprep.subr.mxu0 %v75_v11  ;;  %443 = vmatpush3.msra.mxu1 %v237_v24 }
  0x3b   :  { %416 = vmatpush3.msra.mxu0 %v75_v11  ;;  %444 = vmatprep.subr.mxu1 %v236_v25 }
  0x3c   :  { %417 = vmatprep.subr.mxu0 %v74_v12  ;;  %445 = vmatpush3.msra.mxu1 %v236_v25 }
  0x3d   :  { %418 = vmatpush3.msra.mxu0 %v74_v12  ;;  %446 = vmatprep.subr.mxu1 %v235_v26 }
  0x3e   :  { %419 = vmatprep.subr.mxu0 %v73_v13  ;;  %447 = vmatpush3.msra.mxu1 %v235_v26 }
  0x3f   :  { %420 = vmatpush3.msra.mxu0 %v73_v13  ;;  %448 = vmatprep.subr.mxu1 %v234_v27 }
  0x40   :  { %421 = vmatprep.subr.mxu0 %v72_v14  ;;  %449 = vmatpush3.msra.mxu1 %v234_v27 }
  0x41   :  { %422 = vmatpush3.msra.mxu0 %v72_v14  ;;  %450 = vmatprep.subr.mxu1 %v233_v28 }
  0x42   :  { %423 = vmatprep.subr.mxu0 %v71_v15  ;;  %451 = vmatpush3.msra.mxu1 %v233_v28 }
  0x43   :  { %424 = vmatpush3.msra.mxu0 %v71_v15  ;;  %452 = vmatprep.subr.mxu1 %v232_v29 }
  0x44   :  { %425 = vmatprep.subr.mxu0 %v70_v16  ;;  %453 = vmatpush3.msra.mxu1 %v232_v29 }
  0x45   :  { %426 = vmatpush3.msra.mxu0 %v70_v16  ;;  %454 = vmatprep.subr.mxu1 %v231_v30 }
  0x46   :  { %428 = vmatmul.mubr.f32.vlgmr.msra.gmra.mxu0 %v69_v17  ;;  %455 = vmatpush3.msra.mxu1 %v231_v30 }
  0x47   :  { %456 = vmatprep.subr.mxu1 %v230_v31 }
  0x48   :  { %457 = vmatpush3.msra.mxu1 %v230_v31  ;;  %v358_v31 = vld [vmem:[%s635_s4] ss:$0 sm:$0xff] }
  0x49   :  { %458 = vmatprep.subr.mxu1 %v229_v32 }
  0x4a   :  { %459 = vmatpush3.msra.mxu1 %v229_v32 }
  0x4b   :  { %460 = vmatprep.subr.mxu1 %v228_v33 }
  0x4c   :  { %461 = vmatpush3.msra.mxu1 %v228_v33 }
 0x106   :  { %v429_v35 = vpop.f32.mrf.mxu0 }
 0x107   :  { %v165_v36 = vadd.f32 %v429_v35, %v357_v34 }
 0x108   :  { %v159_v37 = vpop.f32.mrf.mxu0 }
 0x109   :  { %v171_v38 = vmul.f32 0.70710677, %v165_v36  ;;  %v160_v39 = vadd.f32 %v357_v34, %v159_v37  ;;  %v169_v28 = vmul.f32 0.5, %v165_v36 }
 0x10b   :  { %v173_v40 = vand.u32 2147483647, %v171_v38  ;;  %v170_v41 = vmul.f32 0.70710677, %v160_v39  ;;  %vm217_vm0 = vcmp.lt.f32.partialorder %v171_v38, 0.0  ;;  %v168_v26 = vmul.f32 0.5, %v160_v39 }
 0x10d   :  { %v175_v42 = vmul.f32 0.3275911, %v173_v40  ;;  %v172_v43 = vand.u32 2147483647, %v170_v41  ;;  %v205_v47 = vsub.f32 0.0, %v173_v40  ;;  %vm216_vm1 = vcmp.lt.f32.partialorder %v170_v41, 0.0 }
 0x10f   :  { %v177_v44 = vadd.f32 1.0, %v175_v42  ;;  %v174_v45 = vmul.f32 0.3275911, %v172_v43  ;;  %v204_v50 = vsub.f32 0.0, %v172_v43  ;;  %v207_v53 = vmul.f32 %v205_v47, %v173_v40 }
 0x111   :  { %471 = vrcp.f32 %v177_v44  ;;  %v176_v46 = vadd.f32 1.0, %v174_v45  ;;  %v206_v57 = vmul.f32 %v204_v50, %v172_v43  ;;  %v210_v58 = vmul.f32 1.442695, %v207_v53 }
 0x113   :  { %473 = vrcp.f32 %v176_v46  ;;  %v208_v62 = vmul.f32 1.442695, %v206_v57 }
 0x114   :  { %475 = vpow2.f32 %v210_v58 }
 0x115   :  { %477 = vpow2.f32 %v208_v62 }
 0x11e   :  { %v472_v48 = vpop.eup %471 }
 0x11f   :  { %v181_v49 = vmul.f32 %v472_v48, %v177_v44 }
 0x120   :  { %v474_v51 = vpop.eup %473 }
 0x121   :  { %v183_v52 = vsub.f32 2.0, %v181_v49  ;;  %v180_v54 = vmul.f32 %v474_v51, %v176_v46  ;;  %v476_v13 = vpop.eup %475 }
 0x122   :  { %v478_v17 = vpop.eup %477 }
 0x123   :  { %v185_v55 = vmul.f32 %v472_v48, %v183_v52  ;;  %v182_v56 = vsub.f32 2.0, %v180_v54 }
 0x125   :  { %v187_v59 = vmul.f32 1.0614054, %v185_v55  ;;  %v184_v60 = vmul.f32 %v474_v51, %v182_v56 }
 0x127   :  { %v189_v61 = vadd.f32 -1.4531521, %v187_v59  ;;  %v186_v63 = vmul.f32 1.0614054, %v184_v60 }
 0x129   :  { %v191_v0 = vmul.f32 %v189_v61, %v185_v55  ;;  %v188_v1 = vadd.f32 -1.4531521, %v186_v63 }
 0x12b   :  { %v193_v2 = vadd.f32 1.4214138, %v191_v0  ;;  %v190_v3 = vmul.f32 %v188_v1, %v184_v60 }
 0x12d   :  { %v195_v4 = vmul.f32 %v193_v2, %v185_v55  ;;  %v192_v5 = vadd.f32 1.4214138, %v190_v3 }
 0x12f   :  { %v197_v6 = vadd.f32 -0.28449672, %v195_v4  ;;  %v194_v7 = vmul.f32 %v192_v5, %v184_v60 }
 0x131   :  { %v199_v8 = vmul.f32 %v197_v6, %v185_v55  ;;  %v196_v9 = vadd.f32 -0.28449672, %v194_v7 }
 0x133   :  { %v201_v10 = vadd.f32 0.2548296, %v199_v8  ;;  %v198_v11 = vmul.f32 %v196_v9, %v184_v60 }
 0x135   :  { %v203_v12 = vmul.f32 %v201_v10, %v185_v55  ;;  %v200_v14 = vadd.f32 0.2548296, %v198_v11 }
 0x137   :  { %v213_v15 = vmul.f32 %v476_v13, %v203_v12  ;;  %v202_v16 = vmul.f32 %v200_v14, %v184_v60 }
 0x139   :  { %v215_v18 = vsub.f32 1.0, %v213_v15  ;;  %v212_v19 = vmul.f32 %v478_v17, %v202_v16 }
 0x13b   :  { %v219_v20 = vsub.f32 0.0, %v215_v18  ;;  %v214_v21 = vsub.f32 1.0, %v212_v19 }
 0x13d   :  { %v221_v22 = vsel %vm217_vm0, %v219_v20, %v215_v18  ;;  %v218_v23 = vsub.f32 0.0, %v214_v21 }
 0x13e   :  { %v223_v25 = vadd.f32 1.0, %v221_v22 }
 0x13f   :  { %v220_v24 = vsel %vm216_vm1, %v218_v23, %v214_v21 }
 0x140   :  { %v222_v27 = vadd.f32 1.0, %v220_v24  ;;  %v225_v30 = vmul.f32 %v223_v25, %v169_v28 }
 0x142   :  { %v224_v29 = vmul.f32 %v222_v27, %v168_v26 }
 0x144   :  { %462 = vmatprep.mubr.f32.mxu1 %v224_v29 }
 0x145   :  { %463 = vmatmul.mubr.f32.vlgmr.msra.gmra.mxu1 %v225_v30 }
 0x205   :  { %v464_v32 = vpop.f32.mrf.mxu1 }
 0x206   :  { %v336_v33 = vadd.f32 %v464_v32, %v358_v31 }
 0x207   :  { %v310_v34 = vpop.f32.mrf.mxu1 }
 0x208   :  { %338 = vst [vmem:[#allocation9 + $0x8] sm:$0xff] %v336_v33  ;;  %v335_v35 = vadd.f32 %v358_v31, %v310_v34 }
 0x20a   :  { %337 = vst [vmem:[#allocation9] sm:$0xff] %v335_v35 }
 0x20b   :  { %550 = shalt.err (!%p547_p5)
}
 0x20c   :  { %350 = dma.vmem_to_hbm [thread:$0]  %s345_s11, 256, %s636_s5, [#allocation5], %s567_s23, %s567_s23, %s568_s24  }
 0x20d   :  { %563 = dma.done.wait [#allocation5], 256  }
 0x20e   :  { %564 = vsyncadd [#allocation5], 4294967040 }
 0x20f   :  { %354 = vsyncpa [#allocation4], 1 }
 0x210   :  { %355 = vsyncpa [#allocation7], 1 }
 0x211   :  { %356 = vsyncpa [#allocation5], 1 }

// kernel: tpu_custom_call.1
= control target key start
LH: loop header
LB: loop body
LE: loop exit
PB: predicated region body
PF: predicated region fallthrough
CT: control target
= control target key end

     0   :  { %10 = vsyncpa [#allocation4], 0  ;;  %s631_s0 = inlined_call_operand.hbm [shape: f32[16,128], index: 0, kind: input, shape index: {}]   ;;  %s632_s1 = inlined_call_operand.hbm [shape: f32[128,128], index: 1, kind: input, shape index: {}]   ;;  %s633_s2 = inlined_call_operand.vmem [shape: f32[1,128], index: 2, kind: input, shape index: {}]   ;;  %s634_s3 = inlined_call_operand.hbm [shape: f32[128,128], index: 3, kind: input, shape index: {}]   ;;  %s635_s4 = inlined_call_operand.vmem [shape: f32[1,128], index: 4, kind: input, shape index: {}]   ;;  %s636_s5 = inlined_call_operand.hbm [shape: f32[16,128], index: 5, kind: output, shape index: {}]  }
   0x1   :  { %11 = vsyncpa [#allocation7], 0 }
   0x2   :  { %12 = vsyncpa [#allocation5], 0  ;;  %s565_s18 = smov [#allocation6]   ;;  %s566_s20 = smov [#allocation3]  }
   0x3   :  { %s30_s19 = sshll.u32 %s565_s18, 4  ;;  %s18_s21 = sshll.u32 %s566_s20, 4  ;;  %s31_s19 = int_to_ptr.vmem [resolvable:$true] %s30_s19  ;;  %s19_s21 = int_to_ptr.vmem [resolvable:$true] %s18_s21 }
   0x4   :  { %s487_s22 = scalar_lea.vmem %s31_s19, 2048  ;;  %p492_p1 = scmp.lt.s32.totalorder %s31_s19, %s31_s19 }
   0x5   :  { %p488_p0 = scmp.ne.s32.totalorder %s31_s19, %s487_s22  ;;  %p493_p2 = scmp.lt.s32.totalorder %s487_s22, %s487_s22 }
   0x7   :  { %p494_p3 = por %p493_p2, %p492_p1 }
   0x9   :  { %p495_p4 = pnand %p494_p3, %p488_p0 }
   0xb   :  { %498 = shalt.err (!%p495_p4)
}
   0xc   :  { %s567_s23 = smov 128   ;;  %s568_s24 = smov 8  }
   0xd   :  { %36 = dma.hbm_to_vmem [thread:$0]  %s632_s1, 2048, %s31_s19, [#allocation7], %s567_s23, %s567_s23, %s568_s24  }
   0xe   :  { %s507_s27 = scalar_lea.vmem %s19_s21, 256  ;;  %p512_p6 = scmp.lt.s32.totalorder %s19_s21, %s19_s21 }
   0xf   :  { %p508_p5 = scmp.ne.s32.totalorder %s19_s21, %s507_s27  ;;  %p513_p7 = scmp.lt.s32.totalorder %s507_s27, %s507_s27 }
  0x11   :  { %p514_p8 = por %p513_p7, %p512_p6 }
  0x13   :  { %p515_p9 = pnand %p514_p8, %p508_p5 }
  0x15   :  { %518 = shalt.err (!%p515_p9)
}
  0x16   :  { %24 = dma.hbm_to_vmem [thread:$0]  %s631_s0, 256, %s19_s21, [#allocation4], %s567_s23, %s567_s23, %s568_s24  }
  0x17   :  { %s569_s30 = smov [#allocation8]  }
  0x18   :  { %s44_s6 = sshll.u32 %s569_s30, 4  ;;  %s45_s6 = int_to_ptr.vmem [resolvable:$true] %s44_s6 }
  0x19   :  { %s527_s7 = scalar_lea.vmem %s45_s6, 2048  ;;  %p532_p11 = scmp.lt.s32.totalorder %s45_s6, %s45_s6 }
  0x1a   :  { %p528_p10 = scmp.ne.s32.totalorder %s45_s6, %s527_s7  ;;  %p533_p12 = scmp.lt.s32.totalorder %s527_s7, %s527_s7 }
  0x1c   :  { %p534_p13 = por %p533_p12, %p532_p11 }
  0x1e   :  { %p535_p0 = pnand %p534_p13, %p528_p10 }
  0x20   :  { %538 = shalt.err (!%p535_p0)
}
  0x21   :  { %50 = dma.hbm_to_vmem [thread:$0]  %s634_s3, 2048, %s45_s6, [#allocation7], %s567_s23, %s567_s23, %s568_s24  }
  0x22   :  { %559 = dma.done.wait [#allocation4], 256  }
  0x23   :  { %560 = vsyncadd [#allocation4], 4294967040 }
  0x24   :  { %561 = dma.done.wait [#allocation7], 4096  }
  0x25   :  { %562 = vsyncadd [#allocation7], 4294963200  ;;  %v85_v0 = vld [vmem:[#allocation6 + $0x78] sm:$0xff]  ;;  %v84_v1 = vld [vmem:[#allocation6 + $0x70] sm:$0xff]  ;;  %s570_s10 = smov [#allocation9]  }
  0x26   :  { %395 = vmatprep.subr.mxu0 %v85_v0  ;;  %v83_v2 = vld [vmem:[#allocation6 + $0x68] sm:$0xff]  ;;  %v82_v3 = vld [vmem:[#allocation6 + $0x60] sm:$0xff]  ;;  %v68_v4 = vld [vmem:[#allocation3] sm:$0xff]  ;;  %s344_s11 = sshll.u32 %s570_s10, 4  ;;  %s345_s11 = int_to_ptr.vmem [resolvable:$true] %s344_s11 }
  0x27   :  { %396 = vmatpush3.msra.mxu0 %v85_v0  ;;  %v81_v5 = vld [vmem:[#allocation6 + $0x58] sm:$0xff]  ;;  %427 = vmatprep.mubr.f32.mxu0 %v68_v4  ;;  %v80_v6 = vld [vmem:[#allocation6 + $0x50] sm:$0xff]  ;;  %v79_v7 = vld [vmem:[#allocation6 + $0x48] sm:$0xff]  ;;  %s539_s12 = scalar_lea.vmem %s345_s11, 256  ;;  %p544_p2 = scmp.lt.s32.totalorder %s345_s11, %s345_s11 }
  0x28   :  { %397 = vmatprep.subr.mxu0 %v84_v1  ;;  %v78_v8 = vld [vmem:[#allocation6 + $0x40] sm:$0xff]  ;;  %v77_v9 = vld [vmem:[#allocation6 + $0x38] sm:$0xff]  ;;  %v76_v10 = vld [vmem:[#allocation6 + $0x30] sm:$0xff]  ;;  %p540_p1 = scmp.ne.s32.totalorder %s345_s11, %s539_s12  ;;  %p545_p3 = scmp.lt.s32.totalorder %s539_s12, %s539_s12 }
  0x29   :  { %398 = vmatpush3.msra.mxu0 %v84_v1  ;;  %v75_v11 = vld [vmem:[#allocation6 + $0x28] sm:$0xff]  ;;  %v74_v12 = vld [vmem:[#allocation6 + $0x20] sm:$0xff]  ;;  %v73_v13 = vld [vmem:[#allocation6 + $0x18] sm:$0xff] }
  0x2a   :  { %399 = vmatprep.subr.mxu0 %v83_v2  ;;  %v72_v14 = vld [vmem:[#allocation6 + $0x10] sm:$0xff]  ;;  %v71_v15 = vld [vmem:[#allocation6 + $0x8] sm:$0xff]  ;;  %v70_v16 = vld [vmem:[#allocation6] sm:$0xff]  ;;  %p546_p4 = por %p545_p3, %p544_p2 }
  0x2b   :  { %400 = vmatpush3.msra.mxu0 %v83_v2  ;;  %v69_v17 = vld [vmem:[#allocation3 + $0x8] sm:$0xff]  ;;  %v242_v19 = vld [vmem:[#allocation8 + $0x70] sm:$0xff]  ;;  %v241_v20 = vld [vmem:[#allocation8 + $0x68] sm:$0xff] }
  0x2c   :  { %401 = vmatprep.subr.mxu0 %v82_v3  ;;  %v243_v18 = vld [vmem:[#allocation8 + $0x78] sm:$0xff]  ;;  %v240_v21 = vld [vmem:[#allocation8 + $0x60] sm:$0xff]  ;;  %v238_v23 = vld [vmem:[#allocation8 + $0x50] sm:$0xff]  ;;  %p547_p5 = pnand %p546_p4, %p540_p1 }
  0x2d   :  { %402 = vmatpush3.msra.mxu0 %v82_v3  ;;  %430 = vmatprep.subr.mxu1 %v243_v18  ;;  %v239_v22 = vld [vmem:[#allocation8 + $0x58] sm:$0xff]  ;;  %v237_v24 = vld [vmem:[#allocation8 + $0x48] sm:$0xff]  ;;  %v236_v25 = vld [vmem:[#allocation8 + $0x40] sm:$0xff] }
  0x2e   :  { %403 = vmatprep.subr.mxu0 %v81_v5  ;;  %431 = vmatpush3.msra.mxu1 %v243_v18  ;;  %v235_v26 = vld [vmem:[#allocation8 + $0x38] sm:$0xff]  ;;  %v234_v27 = vld [vmem:[#allocation8 + $0x30] sm:$0xff]  ;;  %v233_v28 = vld [vmem:[#allocation8 + $0x28] sm:$0xff] }
  0x2f   :  { %404 = vmatpush3.msra.mxu0 %v81_v5  ;;  %432 = vmatprep.subr.mxu1 %v242_v19  ;;  %v232_v29 = vld [vmem:[#allocation8 + $0x20] sm:$0xff]  ;;  %v231_v30 = vld [vmem:[#allocation8 + $0x18] sm:$0xff]  ;;  %v230_v31 = vld [vmem:[#allocation8 + $0x10] sm:$0xff] }
  0x30   :  { %405 = vmatprep.subr.mxu0 %v80_v6  ;;  %433 = vmatpush3.msra.mxu1 %v242_v19  ;;  %v229_v32 = vld [vmem:[#allocation8 + $0x8] sm:$0xff]  ;;  %v228_v33 = vld [vmem:[#allocation8] sm:$0xff]  ;;  %v357_v34 = vld [vmem:[%s633_s2] ss:$0 sm:$0xff] }
  0x31   :  { %406 = vmatpush3.msra.mxu0 %v80_v6  ;;  %434 = vmatprep.subr.mxu1 %v241_v20 }
  0x32   :  { %407 = vmatprep.subr.mxu0 %v79_v7  ;;  %435 = vmatpush3.msra.mxu1 %v241_v20 }
  0x33   :  { %408 = vmatpush3.msra.mxu0 %v79_v7  ;;  %436 = vmatprep.subr.mxu1 %v240_v21 }
  0x34   :  { %409 = vmatprep.subr.mxu0 %v78_v8  ;;  %437 = vmatpush3.msra.mxu1 %v240_v21 }
  0x35   :  { %410 = vmatpush3.msra.mxu0 %v78_v8  ;;  %438 = vmatprep.subr.mxu1 %v239_v22 }
  0x36   :  { %411 = vmatprep.subr.mxu0 %v77_v9  ;;  %439 = vmatpush3.msra.mxu1 %v239_v22 }
  0x37   :  { %412 = vmatpush3.msra.mxu0 %v77_v9  ;;  %440 = vmatprep.subr.mxu1 %v238_v23 }
  0x38   :  { %413 = vmatprep.subr.mxu0 %v76_v10  ;;  %441 = vmatpush3.msra.mxu1 %v238_v23 }
  0x39   :  { %414 = vmatpush3.msra.mxu0 %v76_v10  ;;  %442 = vmatprep.subr.mxu1 %v237_v24 }
  0x3a   :  { %415 = vmatprep.subr.mxu0 %v75_v11  ;;  %443 = vmatpush3.msra.mxu1 %v237_v24 }
  0x3b   :  { %416 = vmatpush3.msra.mxu0 %v75_v11  ;;  %444 = vmatprep.subr.mxu1 %v236_v25 }
  0x3c   :  { %417 = vmatprep.subr.mxu0 %v74_v12  ;;  %445 = vmatpush3.msra.mxu1 %v236_v25 }
  0x3d   :  { %418 = vmatpush3.msra.mxu0 %v74_v12  ;;  %446 = vmatprep.subr.mxu1 %v235_v26 }
  0x3e   :  { %419 = vmatprep.subr.mxu0 %v73_v13  ;;  %447 = vmatpush3.msra.mxu1 %v235_v26 }
  0x3f   :  { %420 = vmatpush3.msra.mxu0 %v73_v13  ;;  %448 = vmatprep.subr.mxu1 %v234_v27 }
  0x40   :  { %421 = vmatprep.subr.mxu0 %v72_v14  ;;  %449 = vmatpush3.msra.mxu1 %v234_v27 }
  0x41   :  { %422 = vmatpush3.msra.mxu0 %v72_v14  ;;  %450 = vmatprep.subr.mxu1 %v233_v28 }
  0x42   :  { %423 = vmatprep.subr.mxu0 %v71_v15  ;;  %451 = vmatpush3.msra.mxu1 %v233_v28 }
  0x43   :  { %424 = vmatpush3.msra.mxu0 %v71_v15  ;;  %452 = vmatprep.subr.mxu1 %v232_v29 }
  0x44   :  { %425 = vmatprep.subr.mxu0 %v70_v16  ;;  %453 = vmatpush3.msra.mxu1 %v232_v29 }
  0x45   :  { %426 = vmatpush3.msra.mxu0 %v70_v16  ;;  %454 = vmatprep.subr.mxu1 %v231_v30 }
  0x46   :  { %428 = vmatmul.mubr.f32.vlgmr.msra.gmra.mxu0 %v69_v17  ;;  %455 = vmatpush3.msra.mxu1 %v231_v30 }
  0x47   :  { %456 = vmatprep.subr.mxu1 %v230_v31 }
  0x48   :  { %457 = vmatpush3.msra.mxu1 %v230_v31  ;;  %v358_v31 = vld [vmem:[%s635_s4] ss:$0 sm:$0xff] }
  0x49   :  { %458 = vmatprep.subr.mxu1 %v229_v32 }
  0x4a   :  { %459 = vmatpush3.msra.mxu1 %v229_v32 }
  0x4b   :  { %460 = vmatprep.subr.mxu1 %v228_v33 }
  0x4c   :  { %461 = vmatpush3.msra.mxu1 %v228_v33 }
 0x106   :  { %v429_v35 = vpop.f32.mrf.mxu0 }
 0x107   :  { %v165_v36 = vadd.f32 %v429_v35, %v357_v34 }
 0x108   :  { %v159_v37 = vpop.f32.mrf.mxu0 }
 0x109   :  { %v171_v38 = vmul.f32 0.70710677, %v165_v36  ;;  %v160_v39 = vadd.f32 %v357_v34, %v159_v37  ;;  %v169_v28 = vmul.f32 0.5, %v165_v36 }
 0x10b   :  { %v173_v40 = vand.u32 2147483647, %v171_v38  ;;  %v170_v41 = vmul.f32 0.70710677, %v160_v39  ;;  %vm217_vm0 = vcmp.lt.f32.partialorder %v171_v38, 0.0  ;;  %v168_v26 = vmul.f32 0.5, %v160_v39 }
 0x10d   :  { %v175_v42 = vmul.f32 0.3275911, %v173_v40  ;;  %v172_v43 = vand.u32 2147483647, %v170_v41  ;;  %v205_v47 = vsub.f32 0.0, %v173_v40  ;;  %vm216_vm1 = vcmp.lt.f32.partialorder %v170_v41, 0.0 }
 0x10f   :  { %v177_v44 = vadd.f32 1.0, %v175_v42  ;;  %v174_v45 = vmul.f32 0.3275911, %v172_v43  ;;  %v204_v50 = vsub.f32 0.0, %v172_v43  ;;  %v207_v53 = vmul.f32 %v205_v47, %v173_v40 }
 0x111   :  { %471 = vrcp.f32 %v177_v44  ;;  %v176_v46 = vadd.f32 1.0, %v174_v45  ;;  %v206_v57 = vmul.f32 %v204_v50, %v172_v43  ;;  %v210_v58 = vmul.f32 1.442695, %v207_v53 }
 0x113   :  { %473 = vrcp.f32 %v176_v46  ;;  %v208_v62 = vmul.f32 1.442695, %v206_v57 }
 0x114   :  { %475 = vpow2.f32 %v210_v58 }
 0x115   :  { %477 = vpow2.f32 %v208_v62 }
 0x11e   :  { %v472_v48 = vpop.eup %471 }
 0x11f   :  { %v181_v49 = vmul.f32 %v472_v48, %v177_v44 }
 0x120   :  { %v474_v51 = vpop.eup %473 }
 0x121   :  { %v183_v52 = vsub.f32 2.0, %v181_v49  ;;  %v180_v54 = vmul.f32 %v474_v51, %v176_v46  ;;  %v476_v13 = vpop.eup %475 }
 0x122   :  { %v478_v17 = vpop.eup %477 }
 0x123   :  { %v185_v55 = vmul.f32 %v472_v48, %v183_v52  ;;  %v182_v56 = vsub.f32 2.0, %v180_v54 }
 0x125   :  { %v187_v59 = vmul.f32 1.0614054, %v185_v55  ;;  %v184_v60 = vmul.f32 %v474_v51, %v182_v56 }
 0x127   :  { %v189_v61 = vadd.f32 -1.4531521, %v187_v59  ;;  %v186_v63 = vmul.f32 1.0614054, %v184_v60 }
 0x129   :  { %v191_v0 = vmul.f32 %v189_v61, %v185_v55  ;;  %v188_v1 = vadd.f32 -1.4531521, %v186_v63 }
 0x12b   :  { %v193_v2 = vadd.f32 1.4214138, %v191_v0  ;;  %v190_v3 = vmul.f32 %v188_v1, %v184_v60 }
 0x12d   :  { %v195_v4 = vmul.f32 %v193_v2, %v185_v55  ;;  %v192_v5 = vadd.f32 1.4214138, %v190_v3 }
 0x12f   :  { %v197_v6 = vadd.f32 -0.28449672, %v195_v4  ;;  %v194_v7 = vmul.f32 %v192_v5, %v184_v60 }
 0x131   :  { %v199_v8 = vmul.f32 %v197_v6, %v185_v55  ;;  %v196_v9 = vadd.f32 -0.28449672, %v194_v7 }
 0x133   :  { %v201_v10 = vadd.f32 0.2548296, %v199_v8  ;;  %v198_v11 = vmul.f32 %v196_v9, %v184_v60 }
 0x135   :  { %v203_v12 = vmul.f32 %v201_v10, %v185_v55  ;;  %v200_v14 = vadd.f32 0.2548296, %v198_v11 }
 0x137   :  { %v213_v15 = vmul.f32 %v476_v13, %v203_v12  ;;  %v202_v16 = vmul.f32 %v200_v14, %v184_v60 }
 0x139   :  { %v215_v18 = vsub.f32 1.0, %v213_v15  ;;  %v212_v19 = vmul.f32 %v478_v17, %v202_v16 }
 0x13b   :  { %v219_v20 = vsub.f32 0.0, %v215_v18  ;;  %v214_v21 = vsub.f32 1.0, %v212_v19 }
 0x13d   :  { %v221_v22 = vsel %vm217_vm0, %v219_v20, %v215_v18  ;;  %v218_v23 = vsub.f32 0.0, %v214_v21 }
 0x13e   :  { %v223_v25 = vadd.f32 1.0, %v221_v22 }
 0x13f   :  { %v220_v24 = vsel %vm216_vm1, %v218_v23, %v214_v21 }
 0x140   :  { %v222_v27 = vadd.f32 1.0, %v220_v24  ;;  %v225_v30 = vmul.f32 %v223_v25, %v169_v28 }
 0x142   :  { %v224_v29 = vmul.f32 %v222_v27, %v168_v26 }
 0x144   :  { %462 = vmatprep.mubr.f32.mxu1 %v224_v29 }
 0x145   :  { %463 = vmatmul.mubr.f32.vlgmr.msra.gmra.mxu1 %v225_v30 }
 0x205   :  { %v464_v32 = vpop.f32.mrf.mxu1 }
 0x206   :  { %v336_v33 = vadd.f32 %v464_v32, %v358_v31 }
 0x207   :  { %v310_v34 = vpop.f32.mrf.mxu1 }
 0x208   :  { %338 = vst [vmem:[#allocation9 + $0x8] sm:$0xff] %v336_v33  ;;  %v335_v35 = vadd.f32 %v358_v31, %v310_v34 }
 0x20a   :  { %337 = vst [vmem:[#allocation9] sm:$0xff] %v335_v35 }
 0x20b   :  { %550 = shalt.err (!%p547_p5)
}
 0x20c   :  { %350 = dma.vmem_to_hbm [thread:$0]  %s345_s11, 256, %s636_s5, [#allocation5], %s567_s23, %s567_s23, %s568_s24  }
 0x20d   :  { %563 = dma.done.wait [#allocation5], 256  }
 0x20e   :  { %564 = vsyncadd [#allocation5], 4294967040 }
 0x20f   :  { %354 = vsyncpa [#allocation4], 1 }
 0x210   :  { %355 = vsyncpa [#allocation7], 1 }
 0x211   :  { %356 = vsyncpa [#allocation5], 1 }

</bundles_post_ra>
